<compile_context>
chip_gen: v5e
topology: v5e:2x2
jax: 0.10.0
libtpu: 0.0.40
codegen_flags: <defaults>
</compile_context>

<pallas_src>
import jax
import jax.numpy as jnp
from jax.experimental import pallas as pl
from jax.experimental.pallas import tpu as pltpu


def resblock_kernel(x_ref, w1_ref, t1_ref, w2_ref, t2_ref, out_ref):
    # x_ref  : (1, C, L) f32  -- one batch element, module's native NCL layout
    # w*_ref : (3, C, C) bf16 -- per-tap weights (tap, Cin, Cout), BN scale folded in
    # t*_ref : (1, C)    f32  -- folded conv-bias + BN shift
    # out_ref: (1, C, L) f32
    _, C, L = x_ref.shape

    # NCL -> (L, C): channels onto lanes (in-kernel XLU transpose, free slot here).
    x = jnp.transpose(x_ref[0], (1, 0))                          # (L, C) f32

    # Sequence-boundary masks (the conv's zero padding=1); built once, reused by
    # both convs.
    row = jax.lax.broadcasted_iota(jnp.int32, (L, 1), 0)
    is_first = row == 0
    is_last = row == (L - 1)

    def conv3(v, w_ref, t_ref):
        # k=3 conv as three accumulated MXU dots; bf16 operands, f32 accumulate.
        left = jnp.where(is_first, 0.0, pltpu.roll(v, shift=1, axis=0))      # v[l-1]
        right = jnp.where(is_last, 0.0, pltpu.roll(v, shift=L - 1, axis=0))  # v[l+1]
        acc = jnp.dot(left.astype(jnp.bfloat16), w_ref[0],
                      preferred_element_type=jnp.float32)
        acc += jnp.dot(v.astype(jnp.bfloat16), w_ref[1],
                       preferred_element_type=jnp.float32)
        acc += jnp.dot(right.astype(jnp.bfloat16), w_ref[2],
                       preferred_element_type=jnp.float32)
        return acc + t_ref[...]                                   # (L, C) f32

    h = jnp.maximum(conv3(x, w1_ref, t1_ref), 0.0)                # conv1 -> BN1 -> ReLU
    o = jnp.maximum(conv3(h, w2_ref, t2_ref) + x, 0.0)            # conv2 -> BN2 -> +res -> ReLU
    out_ref[0] = jnp.transpose(o, (1, 0))                         # (L, C) -> (C, L)


def residual_block_pallas(x_ncl, params, eps=1e-5):
    """x_ncl: (N, C, L) float32 — same convention as the PyTorch module."""
    (w1, b1, g1, be1, m1, v1, w2, b2, g2, be2, m2, v2) = params
    N, C, L = x_ncl.shape

    # Pad channels up to a lane-dense multiple of 128: zero input channels / zero
    # weight columns contribute nothing and are sliced off at the end.
    Cp = ((C + 127) // 128) * 128

    def fold(w, b, g, be, m, v):
        # PyTorch conv weight (Co, Ci, 3): tap k multiplies x[l + k - 1].
        # Build (3, Ci, Co) per-tap matrices with the eval-mode BN scale folded
        # into the output-channel columns; conv bias + BN shift collapse into one
        # per-channel shift applied in f32 inside the kernel.
        scale = g / jnp.sqrt(v + eps)                                     # (C,)
        shift = be + (b - m) * scale                                      # (C,)
        wk = jnp.stack([w[:, :, k].T * scale[None, :] for k in range(3)], axis=0)
        if Cp != C:
            wk = jnp.pad(wk, ((0, 0), (0, Cp - C), (0, Cp - C)))
            shift = jnp.pad(shift, (0, Cp - C))
        return wk.astype(jnp.bfloat16), shift.reshape(1, Cp).astype(jnp.float32)

    w1s, t1 = fold(w1, b1, g1, be1, m1, v1)
    w2s, t2 = fold(w2, b2, g2, be2, m2, v2)

    xin = x_ncl.astype(jnp.float32)
    if Cp != C:
        xin = jnp.pad(xin, ((0, 0), (0, Cp - C), (0, 0)))

    flops = 2 * (2 * 3 * Cp) * N * L * Cp                  # two k=3 convs on the MXU
    bytes_accessed = 2 * N * Cp * L * 4 + 2 * (3 * Cp * Cp * 2 + Cp * 4)

    out = pl.pallas_call(
        resblock_kernel,
        out_shape=jax.ShapeDtypeStruct((N, Cp, L), jnp.float32),
        grid_spec=pltpu.PrefetchScalarGridSpec(
            num_scalar_prefetch=0,
            grid=(N,),                                       # >=2 steps: pipelining + megacore
            in_specs=[
                pl.BlockSpec((1, Cp, L), lambda b: (b, 0, 0)),    # x, one batch element
                pl.BlockSpec((3, Cp, Cp), lambda b: (0, 0, 0)),   # conv1 taps (bf16, scaled)
                pl.BlockSpec((1, Cp), lambda b: (0, 0)),          # shift1
                pl.BlockSpec((3, Cp, Cp), lambda b: (0, 0, 0)),   # conv2 taps (bf16, scaled)
                pl.BlockSpec((1, Cp), lambda b: (0, 0)),          # shift2
            ],
            out_specs=pl.BlockSpec((1, Cp, L), lambda b: (b, 0, 0)),
        ),
        compiler_params=pltpu.CompilerParams(
            dimension_semantics=("parallel",),               # batch axis shards across TCs
        ),
        cost_estimate=pl.CostEstimate(
            flops=flops, transcendentals=0, bytes_accessed=bytes_accessed),
    )(xin, w1s, t1, w2s, t2)

    return out[:, :C, :]


def residual_block_ref(x_ncl, params, eps=1e-5):
    """Pure-JAX reference mirroring the PyTorch module (eval-mode BN, f32)."""
    (w1, b1, g1, be1, m1, v1, w2, b2, g2, be2, m2, v2) = params

    def conv1d(x, w, b):
        y = jax.lax.conv_general_dilated(
            x, w, window_strides=(1,), padding=((1, 1),),
            dimension_numbers=("NCH", "OIH", "NCH"))
        return y + b[None, :, None]

    def bn(x, g, be, m, v):
        return g[None, :, None] * (x - m[None, :, None]) / jnp.sqrt(v[None, :, None] + eps) \
            + be[None, :, None]

    h = jnp.maximum(bn(conv1d(x_ncl, w1, b1), g1, be1, m1, v1), 0.0)
    o = bn(conv1d(h, w2, b2), g2, be2, m2, v2)
    return jnp.maximum(o + x_ncl, 0.0)


if __name__ == "__main__":
    # Residual add requires in_channels == out_channels and stride == 1.
    # C multiple of 128 -> channels exactly fill the lanes; L = 128 -> fully
    # tile-aligned in-kernel transposes and a full-M MXU matmul per tap.
    N, C, L = 2, 128, 128

    key = jax.random.PRNGKey(0)
    ks = jax.random.split(key, 13)
    x = jax.random.normal(ks[0], (N, C, L), dtype=jnp.float32)

    # conv1 / bn1
    w1 = 0.1 * jax.random.normal(ks[1], (C, C, 3), dtype=jnp.float32)
    b1 = 0.1 * jax.random.normal(ks[2], (C,), dtype=jnp.float32)
    g1 = 1.0 + 0.1 * jax.random.normal(ks[3], (C,), dtype=jnp.float32)
    be1 = 0.1 * jax.random.normal(ks[4], (C,), dtype=jnp.float32)
    m1 = 0.1 * jax.random.normal(ks[5], (C,), dtype=jnp.float32)
    v1 = jax.random.uniform(ks[6], (C,), minval=0.5, maxval=1.5, dtype=jnp.float32)

    # conv2 / bn2
    w2 = 0.1 * jax.random.normal(ks[7], (C, C, 3), dtype=jnp.float32)
    b2 = 0.1 * jax.random.normal(ks[8], (C,), dtype=jnp.float32)
    g2 = 1.0 + 0.1 * jax.random.normal(ks[9], (C,), dtype=jnp.float32)
    be2 = 0.1 * jax.random.normal(ks[10], (C,), dtype=jnp.float32)
    m2 = 0.1 * jax.random.normal(ks[11], (C,), dtype=jnp.float32)
    v2 = jax.random.uniform(ks[12], (C,), minval=0.5, maxval=1.5, dtype=jnp.float32)

    params = (w1, b1, g1, be1, m1, v1, w2, b2, g2, be2, m2, v2)

    out = jax.block_until_ready(residual_block_pallas(x, params))
    ref = jax.block_until_ready(residual_block_ref(x, params))

    assert out.shape == (N, C, L)
    # bf16 MXU operands with f32 accumulation -> tolerance looser than the pure-f32 path.
    max_err = float(jnp.max(jnp.abs(out - ref)))
    assert jnp.allclose(out, ref, atol=2e-1, rtol=2e-2), f"max abs diff = {max_err}"
    print("KERNEL_OK")
</pallas_src>

<mosaic_0001>
module attributes {stable_mosaic.version = 11 : i64} {
  func.func @resblock_kernel(%arg0: i32, %arg1: memref<1x128x128xf32, #tpu.memory_space<vmem>>, %arg2: memref<3x128x128xbf16, #tpu.memory_space<vmem>>, %arg3: memref<1x128xf32, #tpu.memory_space<vmem>>, %arg4: memref<3x128x128xbf16, #tpu.memory_space<vmem>>, %arg5: memref<1x128xf32, #tpu.memory_space<vmem>>, %arg6: memref<1x128x128xf32, #tpu.memory_space<vmem>>) attributes {dimension_semantics = [#tpu.dimension_semantics<parallel>], iteration_bounds = array<i64: 2>, scalar_prefetch = 0 : i64, scratch_operands = 0 : i64, tpu.core_type = #tpu.core_type<tc>, window_params = [{transform_indices = @transform_0, window_bounds = array<i64: 1, 128, 128>}, {pipeline_mode = #tpu.pipeline_mode<synchronous>, transform_indices = @transform_1, window_bounds = array<i64: 3, 128, 128>}, {pipeline_mode = #tpu.pipeline_mode<synchronous>, transform_indices = @transform_2, window_bounds = array<i64: 1, 128>}, {pipeline_mode = #tpu.pipeline_mode<synchronous>, transform_indices = @transform_3, window_bounds = array<i64: 3, 128, 128>}, {pipeline_mode = #tpu.pipeline_mode<synchronous>, transform_indices = @transform_4, window_bounds = array<i64: 1, 128>}, {transform_indices = @transform_5, window_bounds = array<i64: 1, 128, 128>}]} {
    %c0 = arith.constant 0 : index
    %c0_0 = arith.constant 0 : index
    %c0_1 = arith.constant 0 : index
    %0 = vector.load %arg1[%c0, %c0_0, %c0_1] : memref<1x128x128xf32, #tpu.memory_space<vmem>>, vector<1x128x128xf32>
    %1 = vector.shape_cast %0 : vector<1x128x128xf32> to vector<128x128xf32>
    %2 = tpu.transpose %1, [1, 0] : vector<128x128xf32> -> vector<128x128xf32>
    %3 = tpu.iota {dimensions = array<i32: 0>} : vector<128x1xi32>
    %c0_i32 = arith.constant 0 : i32
    %4 = vector.broadcast %c0_i32 : i32 to vector<128x1xi32>
    %5 = arith.cmpi eq, %3, %4 : vector<128x1xi32>
    %c127_i32 = arith.constant 127 : i32
    %6 = vector.broadcast %c127_i32 : i32 to vector<128x1xi32>
    %7 = arith.cmpi eq, %3, %6 : vector<128x1xi32>
    %c1_i32 = arith.constant 1 : i32
    %8 = tpu.dynamic_rotate %2 by %c1_i32 dim 0 : vector<128x128xf32>, i32 -> vector<128x128xf32>
    %cst = arith.constant 0.000000e+00 : f32
    %9 = vector.shape_cast %5 : vector<128x1xi1> to vector<128x1xi1>
    %10 = vector.broadcast %9 : vector<128x1xi1> to vector<128x128xi1>
    %11 = vector.broadcast %cst : f32 to vector<128x128xf32>
    %12 = arith.select %10, %11, %8 : vector<128x128xi1>, vector<128x128xf32>
    %c127_i32_2 = arith.constant 127 : i32
    %13 = tpu.dynamic_rotate %2 by %c127_i32_2 dim 0 : vector<128x128xf32>, i32 -> vector<128x128xf32>
    %cst_3 = arith.constant 0.000000e+00 : f32
    %14 = vector.shape_cast %7 : vector<128x1xi1> to vector<128x1xi1>
    %15 = vector.broadcast %14 : vector<128x1xi1> to vector<128x128xi1>
    %16 = vector.broadcast %cst_3 : f32 to vector<128x128xf32>
    %17 = arith.select %15, %16, %13 : vector<128x128xi1>, vector<128x128xf32>
    %18 = arith.truncf %12 : vector<128x128xf32> to vector<128x128xbf16>
    %c0_4 = arith.constant 0 : index
    %c0_5 = arith.constant 0 : index
    %c0_6 = arith.constant 0 : index
    %19 = vector.load %arg2[%c0_4, %c0_5, %c0_6] : memref<3x128x128xbf16, #tpu.memory_space<vmem>>, vector<1x128x128xbf16>
    %20 = vector.shape_cast %19 : vector<1x128x128xbf16> to vector<128x128xbf16>
    %cst_7 = arith.constant dense<0.000000e+00> : vector<128x128xf32>
    %21 = tpu.matmul %18, %20, %cst_7 {dimension_numbers = #tpu.dot_dimension_numbers<[1], [0], [0], [1], [0, 0, 1, 1], [], []>} : vector<128x128xbf16>, vector<128x128xbf16>, vector<128x128xf32> -> vector<128x128xf32>
    %22 = arith.truncf %2 : vector<128x128xf32> to vector<128x128xbf16>
    %c1 = arith.constant 1 : index
    %c0_8 = arith.constant 0 : index
    %c0_9 = arith.constant 0 : index
    %23 = vector.load %arg2[%c1, %c0_8, %c0_9] : memref<3x128x128xbf16, #tpu.memory_space<vmem>>, vector<1x128x128xbf16>
    %24 = vector.shape_cast %23 : vector<1x128x128xbf16> to vector<128x128xbf16>
    %cst_10 = arith.constant dense<0.000000e+00> : vector<128x128xf32>
    %25 = tpu.matmul %22, %24, %cst_10 {dimension_numbers = #tpu.dot_dimension_numbers<[1], [0], [0], [1], [0, 0, 1, 1], [], []>} : vector<128x128xbf16>, vector<128x128xbf16>, vector<128x128xf32> -> vector<128x128xf32>
    %26 = arith.addf %21, %25 : vector<128x128xf32>
    %27 = arith.truncf %17 : vector<128x128xf32> to vector<128x128xbf16>
    %c2 = arith.constant 2 : index
    %c0_11 = arith.constant 0 : index
    %c0_12 = arith.constant 0 : index
    %28 = vector.load %arg2[%c2, %c0_11, %c0_12] : memref<3x128x128xbf16, #tpu.memory_space<vmem>>, vector<1x128x128xbf16>
    %29 = vector.shape_cast %28 : vector<1x128x128xbf16> to vector<128x128xbf16>
    %cst_13 = arith.constant dense<0.000000e+00> : vector<128x128xf32>
    %30 = tpu.matmul %27, %29, %cst_13 {dimension_numbers = #tpu.dot_dimension_numbers<[1], [0], [0], [1], [0, 0, 1, 1], [], []>} : vector<128x128xbf16>, vector<128x128xbf16>, vector<128x128xf32> -> vector<128x128xf32>
    %31 = arith.addf %26, %30 : vector<128x128xf32>
    %c0_14 = arith.constant 0 : index
    %c0_15 = arith.constant 0 : index
    %32 = vector.load %arg3[%c0_14, %c0_15] : memref<1x128xf32, #tpu.memory_space<vmem>>, vector<1x128xf32>
    %33 = vector.broadcast %32 : vector<1x128xf32> to vector<128x128xf32>
    %34 = arith.addf %31, %33 : vector<128x128xf32>
    %cst_16 = arith.constant 0.000000e+00 : f32
    %35 = vector.broadcast %cst_16 : f32 to vector<128x128xf32>
    %36 = arith.maximumf %34, %35 : vector<128x128xf32>
    %c1_i32_17 = arith.constant 1 : i32
    %37 = tpu.dynamic_rotate %36 by %c1_i32_17 dim 0 : vector<128x128xf32>, i32 -> vector<128x128xf32>
    %cst_18 = arith.constant 0.000000e+00 : f32
    %38 = vector.shape_cast %5 : vector<128x1xi1> to vector<128x1xi1>
    %39 = vector.broadcast %38 : vector<128x1xi1> to vector<128x128xi1>
    %40 = vector.broadcast %cst_18 : f32 to vector<128x128xf32>
    %41 = arith.select %39, %40, %37 : vector<128x128xi1>, vector<128x128xf32>
    %c127_i32_19 = arith.constant 127 : i32
    %42 = tpu.dynamic_rotate %36 by %c127_i32_19 dim 0 : vector<128x128xf32>, i32 -> vector<128x128xf32>
    %cst_20 = arith.constant 0.000000e+00 : f32
    %43 = vector.shape_cast %7 : vector<128x1xi1> to vector<128x1xi1>
    %44 = vector.broadcast %43 : vector<128x1xi1> to vector<128x128xi1>
    %45 = vector.broadcast %cst_20 : f32 to vector<128x128xf32>
    %46 = arith.select %44, %45, %42 : vector<128x128xi1>, vector<128x128xf32>
    %47 = arith.truncf %41 : vector<128x128xf32> to vector<128x128xbf16>
    %c0_21 = arith.constant 0 : index
    %c0_22 = arith.constant 0 : index
    %c0_23 = arith.constant 0 : index
    %48 = vector.load %arg4[%c0_21, %c0_22, %c0_23] : memref<3x128x128xbf16, #tpu.memory_space<vmem>>, vector<1x128x128xbf16>
    %49 = vector.shape_cast %48 : vector<1x128x128xbf16> to vector<128x128xbf16>
    %cst_24 = arith.constant dense<0.000000e+00> : vector<128x128xf32>
    %50 = tpu.matmul %47, %49, %cst_24 {dimension_numbers = #tpu.dot_dimension_numbers<[1], [0], [0], [1], [0, 0, 1, 1], [], []>} : vector<128x128xbf16>, vector<128x128xbf16>, vector<128x128xf32> -> vector<128x128xf32>
    %51 = arith.truncf %36 : vector<128x128xf32> to vector<128x128xbf16>
    %c1_25 = arith.constant 1 : index
    %c0_26 = arith.constant 0 : index
    %c0_27 = arith.constant 0 : index
    %52 = vector.load %arg4[%c1_25, %c0_26, %c0_27] : memref<3x128x128xbf16, #tpu.memory_space<vmem>>, vector<1x128x128xbf16>
    %53 = vector.shape_cast %52 : vector<1x128x128xbf16> to vector<128x128xbf16>
    %cst_28 = arith.constant dense<0.000000e+00> : vector<128x128xf32>
    %54 = tpu.matmul %51, %53, %cst_28 {dimension_numbers = #tpu.dot_dimension_numbers<[1], [0], [0], [1], [0, 0, 1, 1], [], []>} : vector<128x128xbf16>, vector<128x128xbf16>, vector<128x128xf32> -> vector<128x128xf32>
    %55 = arith.addf %50, %54 : vector<128x128xf32>
    %56 = arith.truncf %46 : vector<128x128xf32> to vector<128x128xbf16>
    %c2_29 = arith.constant 2 : index
    %c0_30 = arith.constant 0 : index
    %c0_31 = arith.constant 0 : index
    %57 = vector.load %arg4[%c2_29, %c0_30, %c0_31] : memref<3x128x128xbf16, #tpu.memory_space<vmem>>, vector<1x128x128xbf16>
    %58 = vector.shape_cast %57 : vector<1x128x128xbf16> to vector<128x128xbf16>
    %cst_32 = arith.constant dense<0.000000e+00> : vector<128x128xf32>
    %59 = tpu.matmul %56, %58, %cst_32 {dimension_numbers = #tpu.dot_dimension_numbers<[1], [0], [0], [1], [0, 0, 1, 1], [], []>} : vector<128x128xbf16>, vector<128x128xbf16>, vector<128x128xf32> -> vector<128x128xf32>
    %60 = arith.addf %55, %59 : vector<128x128xf32>
    %c0_33 = arith.constant 0 : index
    %c0_34 = arith.constant 0 : index
    %61 = vector.load %arg5[%c0_33, %c0_34] : memref<1x128xf32, #tpu.memory_space<vmem>>, vector<1x128xf32>
    %62 = vector.broadcast %61 : vector<1x128xf32> to vector<128x128xf32>
    %63 = arith.addf %60, %62 : vector<128x128xf32>
    %64 = arith.addf %63, %2 : vector<128x128xf32>
    %cst_35 = arith.constant 0.000000e+00 : f32
    %65 = vector.broadcast %cst_35 : f32 to vector<128x128xf32>
    %66 = arith.maximumf %64, %65 : vector<128x128xf32>
    %67 = tpu.transpose %66, [1, 0] : vector<128x128xf32> -> vector<128x128xf32>
    %c0_36 = arith.constant 0 : index
    %c0_37 = arith.constant 0 : index
    %c0_38 = arith.constant 0 : index
    %68 = vector.load %arg6[%c0_36, %c0_37, %c0_38] : memref<1x128x128xf32, #tpu.memory_space<vmem>>, vector<1x128x128xf32>
    %69 = vector.shape_cast %68 : vector<1x128x128xf32> to vector<128x128xf32>
    %70 = vector.shape_cast %67 : vector<128x128xf32> to vector<1x128x128xf32>
    tpu.vector_store %arg6[%c0_36, %c0_37, %c0_38], %70 {strides = array<i32>} : memref<1x128x128xf32, #tpu.memory_space<vmem>>, vector<1x128x128xf32>,
    return
  }
  func.func @transform_0(%arg0: i32) -> (i32, i32, i32) {
    %c0_i32 = arith.constant 0 : i32
    %c0_i32_0 = arith.constant 0 : i32
    %c0_i32_1 = arith.constant 0 : i32
    return %arg0, %c0_i32, %c0_i32_0 : i32, i32, i32
  }
  func.func @transform_1(%arg0: i32) -> (i32, i32, i32) {
    %c0_i32 = arith.constant 0 : i32
    %c0_i32_0 = arith.constant 0 : i32
    %c0_i32_1 = arith.constant 0 : i32
    %c0_i32_2 = arith.constant 0 : i32
    return %c0_i32, %c0_i32_0, %c0_i32_1 : i32, i32, i32
  }
  func.func @transform_2(%arg0: i32) -> (i32, i32) {
    %c0_i32 = arith.constant 0 : i32
    %c0_i32_0 = arith.constant 0 : i32
    %c0_i32_1 = arith.constant 0 : i32
    return %c0_i32, %c0_i32_0 : i32, i32
  }
  func.func @transform_3(%arg0: i32) -> (i32, i32, i32) {
    %c0_i32 = arith.constant 0 : i32
    %c0_i32_0 = arith.constant 0 : i32
    %c0_i32_1 = arith.constant 0 : i32
    %c0_i32_2 = arith.constant 0 : i32
    return %c0_i32, %c0_i32_0, %c0_i32_1 : i32, i32, i32
  }
  func.func @transform_4(%arg0: i32) -> (i32, i32) {
    %c0_i32 = arith.constant 0 : i32
    %c0_i32_0 = arith.constant 0 : i32
    %c0_i32_1 = arith.constant 0 : i32
    return %c0_i32, %c0_i32_0 : i32, i32
  }
  func.func @transform_5(%arg0: i32) -> (i32, i32, i32) {
    %c0_i32 = arith.constant 0 : i32
    %c0_i32_0 = arith.constant 0 : i32
    %c0_i32_1 = arith.constant 0 : i32
    return %arg0, %c0_i32, %c0_i32_0 : i32, i32, i32
  }
}

</mosaic_0001>

<bundles_post_ra>
// kernel: tpu_custom_call.1
= control target key start
LH: loop header
LB: loop body
LE: loop exit
PB: predicated region body
PF: predicated region fallthrough
CT: control target
= control target key end

     0   :  { %10 = vsyncpa [#allocation3], 0  ;;  %s2769_s0 = inlined_call_operand.hbm [shape: f32[2,128,128], index: 0, kind: input, shape index: {}]   ;;  %s2770_s1 = inlined_call_operand.hbm [shape: bf16[3,128,128], index: 1, kind: input, shape index: {}]   ;;  %s2771_s2 = inlined_call_operand.vmem [shape: f32[1,128], index: 2, kind: input, shape index: {}]   ;;  %s2772_s3 = inlined_call_operand.hbm [shape: bf16[3,128,128], index: 3, kind: input, shape index: {}]   ;;  %s2773_s4 = inlined_call_operand.vmem [shape: f32[1,128], index: 4, kind: input, shape index: {}]   ;;  %s2774_s5 = inlined_call_operand.hbm [shape: f32[2,128,128], index: 5, kind: output, shape index: {}]  }
   0x1   :  { %12 = vsyncpa [#allocation3 + $0x1], 0 }
   0x2   :  { %13 = vsyncpa [#allocation6], 0 }
   0x3   :  { %14 = vsyncpa [#allocation4], 0 }
   0x4   :  { %16 = vsyncpa [#allocation4 + $0x1], 0  ;;  %s2210_s18 = smov 0   ;;  %s2212_s19 = smov 0  }
   0x5   :  { %s2214_s20 = smov 0   ;;  %s2216_s21 = smov 0  }
   0x6 LB: > { %s2231_s22 = sadd.s32 4294967295, %s2169_s21   ;;  %s1639_s23 = sadd.s32 4294967294, %s2169_s21   ;;  %s2169_s21 = sphi %s2216_s21, %s2788_s21   ;;  %s2165_s20 = sphi %s2214_s20, %s2787_s20   ;;  %s2161_s19 = sphi %s2212_s19, %s2786_s19   ;;  %s2157_s18 = sphi %s2210_s18, %s2785_s18  }
   0x7   : > { %p42_p0 = scmp.ne.s32.totalorder %s2161_s19, %s2157_s18  ;;  %p43_p1 = scmp.eq.s32.totalorder %s2231_s22, 0 }
   0x8   : > { %p150_p2 = scmp.eq.s32.totalorder %s2231_s22, 1  ;;  %p156_p3 = scmp.eq.s32.totalorder %s1639_s23, 1 }
   0x9   : > { %p2240_p4 = por %p43_p1, %p42_p0  ;;  %p1640_p5 = scmp.ge.s32.totalorder %s2169_s21, 1 }
   0xa   : > { %p2245_p6 = por %p156_p3, %p42_p0  ;;  %p163_p7 = scmp.lt.s32.totalorder %s2169_s21, 3 }
   0xb   : > { %s174_s28 = sshll.u32 %s2770_s1, 4  ;;  %s2171_s30 = smov [#allocation5]   ;;  %s175_s28 = int_to_ptr.hbm [resolvable:$true] %s174_s28 }
   0xc   : > { %p2253_p8 = pnand %p1640_p5, %p163_p7  ;;  %s176_s6 = sshll.u32 %s2171_s30, 4  ;;  %s177_s6 = int_to_ptr.vmem [resolvable:$true] %s176_s6 }
   0xd   : > { %s191_s9 = sshll.u32 %s2772_s3, 4  ;;  %s2172_s10 = smov 64   ;;  %s192_s9 = int_to_ptr.hbm [resolvable:$true] %s191_s9 }
   0xe   : > { %p1945_p9 = pneg %p2253_p8  ;;  %s2173_s11 = smov 4  }
   0xf   : > { %s2174_s12 = smov [#allocation7]   ;;  %s2266_s14 = sadd.s32 1, %s2169_s21  }
  0x10   : > { %p1946_p10 = pnand %p1945_p9, %p43_p1  ;;  %s193_s13 = sshll.u32 %s2174_s12, 4  ;;  %s194_s13 = int_to_ptr.vmem [resolvable:$true] %s193_s13 }
  0x11   : > { %s29_s15 = sadd.s32 1, %s2165_s20  ;;  %s26_s16 = ssub.s32 %s2169_s21, %s2266_s14 }
  0x12   : > { %1948 = dma.hbm_to_vmem [thread:$0]  (!%p1946_p10), %s175_s28, 3072, %s177_s6, [#allocation6], %s2172_s10, %s2172_s10, %s2173_s11  }
  0x13   : > { %1951 = dma.hbm_to_vmem [thread:$0]  (!%p1946_p10), %s192_s9, 3072, %s194_s13, [#allocation6], %s2172_s10, %s2172_s10, %s2173_s11  }
  0x14   : > { %p36_p12 = scmp.ne.s32.totalorder %s2165_s20, %s2161_s19  ;;  %p27_p13 = scmp.eq.s32.totalorder %s26_s16, 0 }
  0x15   : > { %p37_p0 = scmp.eq.s32.totalorder %s2169_s21, 0  ;;  %p1962_p5 = scmp.lt.s32.totalorder %s2169_s21, 2 }
  0x16   : > { %p2276_p3 = por %p150_p2, %p36_p12  ;;  %s210_s26 = sand.u32 1, %s2165_s20  }
  0x17   : > { %s2282_s23 = scalar_select %p27_p13, %s2165_s20, %s29_s15  }
  0x18   : > { %p38_p7 = por %p37_p0, %p36_p12  ;;  %s1644_s27 = sshll.u32 %s210_s26, 7 }
  0x19   : > { %s1865_s28 = sshll.u32 %s2169_s21, 7  ;;  %s214_s8 = scalar_lea.vmem [#allocation2], %s1644_s27 }
  0x1a   : > { %s219_s7 = scalar_lea.hbm %s2769_s0, %s1865_s28  ;;  %s222_s9 = sshll.u32 %s214_s8, 4  ;;  %s223_s9 = int_to_ptr.vmem [resolvable:$true] %s222_s9 }
  0x1b   : > { %s220_s10 = sshll.u32 %s219_s7, 4  ;;  %p2289_p2 = pnand %p1962_p5, %p38_p7  ;;  %s221_s10 = int_to_ptr.hbm [resolvable:$true] %s220_s10 }
  0x1c   : > { %s211_s12 = scalar_lea.sflag [#allocation3], %s210_s26  ;;  %s2069_s13 = sshra.s32 %s221_s10, 4  ;;  %s2070_s13 = int_to_ptr.hbm [resolvable:$true] %s2069_s13 }
  0x1d   : > { %s2071_s15 = scalar_lea.hbm %s2070_s13, 128  ;;  %p2073_p10 = pneg %p2289_p2 }
  0x1e   : > { %p2072_p9 = scmp.ne.s32.totalorder %s2070_s13, %s2071_s15  ;;  %s2076_s28 = scalar_lea.hbm %s2769_s0, 256 }
  0x1f   : > { %p2077_p0 = scmp.lt.s32.totalorder %s2070_s13, %s2769_s0  ;;  %p2078_p5 = scmp.lt.s32.totalorder %s2076_s28, %s2071_s15 }
  0x20   : > { %p2074_p12 = pnand %p2073_p10, %p2072_p9 }
  0x21   : > { %p2079_p7 = por %p2078_p5, %p2077_p0 }
  0x22   : > { %p2075_p13 = pneg %p2074_p12 }
  0x24   : > { %p2080_p11 = pnand %p2079_p7, %p2075_p13 }
  0x26   : > { %2083 = shalt.err (!%p2080_p11)
}
  0x27   : > { %s2175_s26 = smov 128   ;;  %s2176_s7 = smov 8  }
  0x28   : > { %1955 = dma.hbm_to_vmem [thread:$0]  (!%p2289_p2), %s221_s10, 2048, %s223_s9, %s211_s12, %s2175_s26, %s2175_s26, %s2176_s7  }
  0x29   : > { %234 = sbr.rel (%p2253_p8) target bundleno = 1041 (0x411), region = 40  ;;  %s2306_s8 = sand.u32 (!%p2253_p8), 1, %s2161_s19  }
  0x2a   : > { %s1648_s13 = sshll.u32 (!%p2253_p8), %s2306_s8, 7  ;;  %s237_s15 = scalar_lea.sflag (!%p2253_p8), [#allocation3], %s2306_s8 }
  0x2b   : > { %s2312_s16 = scalar_lea.vmem (!%p2253_p8), [#allocation2], %s1648_s13 }
  0x2e   : > { %2144 = dma.done.wait (%p2240_p4), %s237_s15, 2048  }
  0x2f   : > { %2146 = vsyncadd (%p2240_p4), %s237_s15, 4294965248 }
  0x30   : > { %2148 = dma.done.wait (%p43_p1), [#allocation6], 6144  }
  0x31   : > { %2150 = vsyncadd (%p43_p1), [#allocation6], 4294961152  ;;  %v278_v0 = vld [vmem:[%s2312_s16] sm:$0xff]  ;;  %v279_v1 = vld [vmem:[%s2312_s16 + $0x8] sm:$0xff]  ;;  %v326_v49 = vlaneseq  ;;  %vm2177_vm2 = vmmov 1   ;;  %s2717_s11 = scalar_lea.vmem [#allocation8], %s1648_s13 }
  0x32   : > { %294 = vxpose.xlu0.b32.start [1/16] %v278_v0, 128  ;;  %v280_v2 = vld [vmem:[%s2312_s16 + $0x10] sm:$0xff]  ;;  %v281_v3 = vld [vmem:[%s2312_s16 + $0x18] sm:$0xff]  ;;  %v282_v4 = vld [vmem:[%s2312_s16 + $0x20] sm:$0xff]  ;;  %s1914_s12 = sshll.u32 %s2231_s22, 7  ;;  %s1544_s6 = sshll.u32 %s2717_s11, 4  ;;  %s1545_s6 = int_to_ptr.vmem [resolvable:$true] %s1544_s6 }
  0x33   : > { %v283_v5 = vld [vmem:[%s2312_s16 + $0x28] sm:$0xff]  ;;  %v284_v6 = vld [vmem:[%s2312_s16 + $0x30] sm:$0xff]  ;;  %v285_v7 = vld [vmem:[%s2312_s16 + $0x38] sm:$0xff]  ;;  %v2364_v50 = vshrl.u32 %v326_v49, 7  ;;  %s1543_s30 = scalar_lea.hbm %s2774_s5, %s1914_s12  ;;  %s1532_s7 = scalar_lea.sflag [#allocation4], %s2306_s8 }
  0x34   : > { %v286_v8 = vld [vmem:[%s2312_s16 + $0x40] sm:$0xff]  ;;  %v287_v9 = vld [vmem:[%s2312_s16 + $0x48] sm:$0xff]  ;;  %v288_v10 = vld [vmem:[%s2312_s16 + $0x50] sm:$0xff]  ;;  %s1546_s26 = sshll.u32 %s1543_s30, 4  ;;  %s2119_s24 = scalar_lea.hbm %s2774_s5, 256  ;;  %s1547_s26 = int_to_ptr.hbm [resolvable:$true] %s1546_s26 }
  0x35   : > { %v289_v11 = vld [vmem:[%s2312_s16 + $0x58] sm:$0xff]  ;;  %v1880_v13 = vld [vmem:[#allocation5 + $0x70] sm:$0xff]  ;;  %v290_v14 = vld [vmem:[%s2312_s16 + $0x60] sm:$0xff]  ;;  %vm391_vm0 = vcmp.lt.s32.totalorder %v2364_v50, 1  ;;  %vm1915_vm1 = vcmp.ne.s32.totalorder %v2364_v50, 0  ;;  %vm472_vm4 = vcmp.lt.s32.totalorder %v2364_v50, 7 }
  0x36   : > { %v1881_v12 = vld [vmem:[#allocation5 + $0x78] sm:$0xff]  ;;  %v1879_v15 = vld [vmem:[#allocation5 + $0x68] sm:$0xff]  ;;  %v1878_v16 = vld [vmem:[#allocation5 + $0x60] sm:$0xff]  ;;  %s2113_s13 = sshra.s32 %s1547_s26, 4  ;;  %s2114_s13 = int_to_ptr.hbm [resolvable:$true] %s2113_s13 }
  0x37   : > { %634 = vmatpush.bf16.msra.mxu0 %v1881_v12  ;;  %1917 = vmatpush.bf16.msra.mxu2 %v1881_v12  ;;  %v291_v17 = vld [vmem:[%s2312_s16 + $0x68] sm:$0xff]  ;;  %v1877_v18 = vld [vmem:[#allocation5 + $0x58] sm:$0xff]  ;;  %v1876_v19 = vld [vmem:[#allocation5 + $0x50] sm:$0xff]  ;;  %s2115_s15 = scalar_lea.hbm %s2114_s13, 128  ;;  %p2120_p11 = scmp.lt.s32.totalorder %s2114_s13, %s2774_s5 }
  0x38   : > { %v292_v20 = vld [vmem:[%s2312_s16 + $0x70] sm:$0xff]  ;;  %v293_v21 = vld [vmem:[%s2312_s16 + $0x78] sm:$0xff]  ;;  %v1875_v22 = vld [vmem:[#allocation5 + $0x48] sm:$0xff]  ;;  %p2116_p1 = scmp.ne.s32.totalorder %s2114_s13, %s2115_s15  ;;  %p2121_p2 = scmp.lt.s32.totalorder %s2119_s24, %s2115_s15 }
  0x39   : > { %v1874_v23 = vld [vmem:[#allocation5 + $0x40] sm:$0xff]  ;;  %v1873_v27 = vld [vmem:[#allocation5 + $0x38] sm:$0xff]  ;;  %v1872_v29 = vld [vmem:[#allocation5 + $0x30] sm:$0xff] }
  0x3a   : > { %295 = vxpose.xlu0.b32.cont [2/16] %v279_v1, 128  ;;  %1925 = vmatpush.bf16.msra.mxu3 %v1873_v27  ;;  %v1871_v30 = vld [vmem:[#allocation5 + $0x28] sm:$0xff]  ;;  %v1870_v33 = vld [vmem:[#allocation5 + $0x20] sm:$0xff]  ;;  %v1869_v34 = vld [vmem:[#allocation5 + $0x18] sm:$0xff]  ;;  %p2117_p4 = pnand %p2116_p1, %p2276_p3  ;;  %p2122_p9 = por %p2121_p2, %p2120_p11 }
  0x3b   : > { %635 = vmatpush.bf16.msra.mxu0 %v1880_v13  ;;  %1918 = vmatpush.bf16.msra.mxu2 %v1880_v13  ;;  %v1868_v36 = vld [vmem:[#allocation5 + $0x10] sm:$0xff]  ;;  %v1867_v37 = vld [vmem:[#allocation5 + $0x8] sm:$0xff]  ;;  %v1866_v40 = vld [vmem:[#allocation5] sm:$0xff] }
  0x3c   : > { %731 = vmatpush.bf16.msra.mxu1 %v1873_v27  ;;  %v1889_v41 = vld [vmem:[#allocation5 + $0xb8] sm:$0xff]  ;;  %v1888_v43 = vld [vmem:[#allocation5 + $0xb0] sm:$0xff]  ;;  %v1887_v46 = vld [vmem:[#allocation5 + $0xa8] sm:$0xff]  ;;  %p2118_p8 = pneg %p2117_p4 }
  0x3d   : > { %v1886_v48 = vld [vmem:[#allocation5 + $0xa0] sm:$0xff]  ;;  %v1885_v58 = vld [vmem:[#allocation5 + $0x98] sm:$0xff]  ;;  %v1884_v61 = vld [vmem:[#allocation5 + $0x90] sm:$0xff] }
  0x3e   : > { %1926 = vmatpush.bf16.msra.mxu3 %v1872_v29  ;;  %vm2420_vm3 = vmpackc.low %vm2177_vm2, %vm1915_vm1  ;;  %p2123_p10 = pnand %p2122_p9, %p2118_p8 }
  0x3f   : > { %636 = vmatpush.bf16.msra.mxu0 %v1879_v15  ;;  %1919 = vmatpush.bf16.msra.mxu2 %v1879_v15 }
  0x40   : > { %732 = vmatpush.bf16.msra.mxu1 %v1872_v29 }
  0x42   : > { %296 = vxpose.xlu0.b32.cont [3/16] %v280_v2, 128  ;;  %1927 = vmatpush.bf16.msra.mxu3 %v1871_v30 }
  0x43   : > { %637 = vmatpush.bf16.msra.mxu0 %v1878_v16  ;;  %1920 = vmatpush.bf16.msra.mxu2 %v1878_v16 }
  0x44   : > { %733 = vmatpush.bf16.msra.mxu1 %v1871_v30 }
  0x46   : > { %1928 = vmatpush.bf16.msra.mxu3 %v1870_v33 }
  0x47   : > { %638 = vmatpush.bf16.msra.mxu0 %v1877_v18  ;;  %1921 = vmatpush.bf16.msra.mxu2 %v1877_v18 }
  0x48   : > { %734 = vmatpush.bf16.msra.mxu1 %v1870_v33 }
  0x4a   : > { %297 = vxpose.xlu0.b32.cont [4/16] %v281_v3, 128  ;;  %1929 = vmatpush.bf16.msra.mxu3 %v1869_v34 }
  0x4b   : > { %639 = vmatpush.bf16.msra.mxu0 %v1876_v19  ;;  %1922 = vmatpush.bf16.msra.mxu2 %v1876_v19 }
  0x4c   : > { %735 = vmatpush.bf16.msra.mxu1 %v1869_v34 }
  0x4e   : > { %1930 = vmatpush.bf16.msra.mxu3 %v1868_v36 }
  0x4f   : > { %640 = vmatpush.bf16.msra.mxu0 %v1875_v22  ;;  %1923 = vmatpush.bf16.msra.mxu2 %v1875_v22 }
  0x50   : > { %736 = vmatpush.bf16.msra.mxu1 %v1868_v36 }
  0x52   : > { %298 = vxpose.xlu0.b32.cont [5/16] %v282_v4, 128  ;;  %1931 = vmatpush.bf16.msra.mxu3 %v1867_v37  ;;  %v1883_v4 = vld [vmem:[#allocation5 + $0x88] sm:$0xff] }
  0x53   : > { %641 = vmatpush.bf16.msra.mxu0 %v1874_v23  ;;  %1924 = vmatpush.bf16.msra.mxu2 %v1874_v23 }
  0x54   : > { %737 = vmatpush.bf16.msra.mxu1 %v1867_v37 }
  0x56   : > { %1932 = vmatpush.bf16.msra.mxu3 %v1866_v40 }
  0x57   : > { %853 = vmatpush.bf16.msrb.mxu2 %v1889_v41 }
  0x58   : > { %738 = vmatpush.bf16.msra.mxu1 %v1866_v40 }
  0x5a   : > { %299 = vxpose.xlu0.b32.cont [6/16] %v283_v5, 128 }
  0x5b   : > { %854 = vmatpush.bf16.msrb.mxu2 %v1888_v43 }
  0x5f   : > { %855 = vmatpush.bf16.msrb.mxu2 %v1887_v46 }
  0x62   : > { %300 = vxpose.xlu0.b32.cont [7/16] %v284_v6, 128  ;;  %v1882_v6 = vld [vmem:[#allocation5 + $0x80] sm:$0xff] }
  0x63   : > { %856 = vmatpush.bf16.msrb.mxu2 %v1886_v48 }
  0x67   : > { %857 = vmatpush.bf16.msrb.mxu2 %v1885_v58 }
  0x6a   : > { %301 = vxpose.xlu0.b32.cont [8/16] %v285_v7, 128 }
  0x6b   : > { %858 = vmatpush.bf16.msrb.mxu2 %v1884_v61 }
  0x6f   : > { %859 = vmatpush.bf16.msrb.mxu2 %v1883_v4 }
  0x72   : > { %302 = vxpose.xlu0.b32.cont [9/16] %v286_v8, 128 }
  0x73   : > { %860 = vmatpush.bf16.msrb.mxu2 %v1882_v6 }
  0x7a   : > { %303 = vxpose.xlu0.b32.cont [10/16] %v287_v9, 128 }
  0x82   : > { %304 = vxpose.xlu0.b32.cont [11/16] %v288_v10, 128 }
  0x8a   : > { %305 = vxpose.xlu0.b32.cont [12/16] %v289_v11, 128 }
  0x92   : > { %306 = vxpose.xlu0.b32.cont [13/16] %v290_v14, 128 }
  0x9a   : > { %307 = vxpose.xlu0.b32.cont [14/16] %v291_v17, 128 }
  0xa2   : > { %308 = vxpose.xlu0.b32.cont [15/16] %v292_v20, 128 }
  0xaa   : > { %309 = vxpose.xlu0.b32.end [16/16] %v293_v21, 128 }
  0xd6   : > { %v2338_v24 = vpop.trf.xlu0 }
  0xd7   : > { %v375_v19 = vrot.slane %v2338_v24, 7  ;;  %v456_v37 = vrot.slane %v2338_v24, 1 }
  0xde   : > { %v2340_v25 = vpop.trf.xlu0 }
  0xdf   : > { %v561_v26 = vpack.c.bf16 %v2340_v25, %v2338_v24  ;;  %v376_v16 = vrot.slane %v2340_v25, 7  ;;  %v457_v34 = vrot.slane %v2340_v25, 1 }
  0xe1   : > { %642 = vmatmul.bf16.vlgmr.msra.gmra.mxu0 %v561_v26  ;;  %v406_v22 = vsel %vm391_vm0, %v375_v19, %v376_v16  ;;  %v487_v41 = vsel %vm472_vm4, %v456_v37, %v457_v34 }
  0xe6   : > { %v2344_v28 = vpop.trf.xlu0 }
  0xe7   : > { %v458_v33 = vrot.slane %v2344_v28, 1  ;;  %v377_v40 = vrot.slane %v2344_v28, 7 }
  0xe9   : > { %v405_v46 = vsel %vm391_vm0, %v376_v16, %v377_v40 }
  0xee   : > { %v2346_v31 = vpop.trf.xlu0 }
  0xef   : > { %v562_v32 = vpack.c.bf16 %v2346_v31, %v2344_v28  ;;  %v378_v36 = vrot.slane %v2346_v31, 7 }
  0xf1   : > { %647 = vmatmul.bf16.gmra.mxu0 %v562_v32 }
  0xf6   : > { %v2350_v35 = vpop.trf.xlu0 }
  0xf7   : > { %v460_v49 = vrot.slane %v2350_v35, 1 }
  0xfe   : > { %v2352_v38 = vpop.trf.xlu0 }
  0xff   : > { %v563_v39 = vpack.c.bf16 %v2352_v38, %v2350_v35 }
 0x101   : > { %652 = vmatmul.bf16.gmra.mxu0 %v563_v39  ;;  %v486_v39 = vsel %vm472_vm4, %v457_v34, %v458_v33 }
 0x102   : > { %v780_v43 = vpack.c.bf16 %v486_v39, %v487_v41 }
 0x106   : > { %v2356_v42 = vpop.trf.xlu0 }
 0x10e   : > { %v2358_v44 = vpop.trf.xlu0 }
 0x10f   : > { %v564_v45 = vpack.c.bf16 %v2358_v44, %v2356_v42  ;;  %v382_v53 = vrot.slane %v2358_v44, 7 }
 0x111   : > { %657 = vmatmul.bf16.gmra.mxu0 %v564_v45  ;;  %v404_v45 = vsel %vm391_vm0, %v377_v40, %v378_v36  ;;  %v1904_v40 = vld [vmem:[#allocation7 + $0x70] sm:$0xff] }
 0x112   : > { %v538_v48 = vpack.c.bf16 %v404_v45, %v405_v46  ;;  %v1903_v46 = vld [vmem:[#allocation7 + $0x68] sm:$0xff] }
 0x116   : > { %v2362_v47 = vpop.trf.xlu0 }
 0x117   : > { %v383_v51 = vrot.slane %v2362_v47, 7 }
 0x119   : > { %v399_v57 = vsel %vm391_vm0, %v382_v53, %v383_v51 }
 0x11e   : > { %v2367_v52 = vpop.trf.xlu0 }
 0x11f   : > { %v384_v54 = vrot.slane %v2367_v52, 7  ;;  %v565_v55 = vpack.c.bf16 %v2367_v52, %v2362_v47 }
 0x121   : > { %662 = vmatmul.bf16.vlgmr.msra.gmra.mxu2 %v565_v55  ;;  %v398_v56 = vsel %vm391_vm0, %v383_v51, %v384_v54  ;;  %v459_v51 = vrot.slane %v2346_v31, 1 }
 0x122   : > { %v541_v59 = vpack.c.bf16 %v398_v56, %v399_v57  ;;  %v379_v56 = vrot.slane %v2350_v35, 7 }
 0x123   : > { %v484_v55 = vsel %vm472_vm4, %v459_v51, %v460_v49  ;;  %v485_v57 = vsel %vm472_vm4, %v458_v33, %v459_v51  ;;  %v1913_v51 = vld [vmem:[#allocation7 + $0xb8] sm:$0xff] }
 0x124   : > { %759 = vmatmul.bf16.vlgmr.msra.gmra.mxu3 %v541_v59  ;;  %v781_v58 = vpack.c.bf16 %v484_v55, %v485_v57  ;;  %v403_v61 = vsel %vm391_vm0, %v378_v36, %v379_v56  ;;  %v1905_v36 = vld [vmem:[#allocation7 + $0x78] sm:$0xff]  ;;  %1366 = vmatpush.bf16.msrb.mxu1 %v1913_v51  ;;  %v1912_v55 = vld [vmem:[#allocation7 + $0xb0] sm:$0xff] }
 0x125   : > { %1147 = vmatpush.bf16.msrb.mxu3 %v1905_v36  ;;  %v1901_v57 = vld [vmem:[#allocation7 + $0x58] sm:$0xff] }
 0x126   : > { %v2380_v60 = vpop.trf.xlu0 }
 0x127   : > { %v385_v62 = vrot.slane %v2380_v60, 7 }
 0x128   : > { %1367 = vmatpush.bf16.msrb.mxu1 %v1912_v55 }
 0x129   : > { %v397_v3 = vsel %vm391_vm0, %v384_v54, %v385_v62  ;;  %v380_v54 = vrot.slane %v2352_v38, 7  ;;  %1148 = vmatpush.bf16.msrb.mxu3 %v1904_v40 }
 0x12b   : > { %v402_v59 = vsel %vm391_vm0, %v379_v56, %v380_v54 }
 0x12d   : > { %1149 = vmatpush.bf16.msrb.mxu3 %v1903_v46 }
 0x12e   : > { %v2383_v63 = vpop.trf.xlu0 }
 0x12f   : > { %v386_v0 = vrot.slane %v2383_v63, 7  ;;  %v566_v1 = vpack.c.bf16 %v2383_v63, %v2380_v60 }
 0x131   : > { %667 = vmatmul.bf16.gmra.mxu2 %v566_v1  ;;  %v396_v2 = vsel %vm391_vm0, %v385_v62, %v386_v0  ;;  %v539_v62 = vpack.c.bf16 %v402_v59, %v403_v61  ;;  %v461_v1 = vrot.slane %v2352_v38, 1  ;;  %v1911_v59 = vld [vmem:[#allocation7 + $0xa8] sm:$0xff] }
 0x132   : > { %v542_v5 = vpack.c.bf16 %v396_v2, %v397_v3  ;;  %v381_v3 = vrot.slane %v2356_v42, 7  ;;  %1368 = vmatpush.bf16.msrb.mxu1 %v1911_v59 }
 0x133   : > { %v483_v4 = vsel %vm472_vm4, %v460_v49, %v461_v1 }
 0x134   : > { %764 = vmatmul.bf16.gmra.mxu3 %v542_v5  ;;  %v400_v6 = vsel %vm391_vm0, %v381_v3, %v382_v53  ;;  %v466_v53 = vrot.slane %v2380_v60, 1 }
 0x136   : > { %v2392_v7 = vpop.trf.xlu0 }
 0x137   : > { %v387_v8 = vrot.slane %v2392_v7, 7 }
 0x139   : > { %v395_v13 = vsel %vm391_vm0, %v386_v0, %v387_v8  ;;  %v462_v0 = vrot.slane %v2356_v42, 1 }
 0x13b   : > { %v482_v2 = vsel %vm472_vm4, %v461_v1, %v462_v0 }
 0x13c   : > { %v782_v5 = vpack.c.bf16 %v482_v2, %v483_v4  ;;  %v1899_v4 = vld [vmem:[#allocation7 + $0x48] sm:$0xff] }
 0x13e   : > { %v2395_v9 = vpop.trf.xlu0 }
 0x13f   : > { %v388_v10 = vrot.slane %v2395_v9, 7  ;;  %v567_v11 = vpack.c.bf16 %v2395_v9, %v2392_v7  ;;  %v469_v41 = vrot.slane %v2395_v9, 1 }
 0x141   : > { %672 = vmatmul.bf16.gmra.mxu2 %v567_v11  ;;  %v394_v12 = vsel %vm391_vm0, %v387_v8, %v388_v10  ;;  %v401_v8 = vsel %vm391_vm0, %v380_v54, %v381_v3  ;;  %v464_v11 = vrot.slane %v2362_v47, 1  ;;  %v1902_v54 = vld [vmem:[#allocation7 + $0x60] sm:$0xff] }
 0x142   : > { %v543_v14 = vpack.c.bf16 %v394_v12, %v395_v13  ;;  %v463_v12 = vrot.slane %v2358_v44, 1  ;;  %1150 = vmatpush.bf16.msrb.mxu3 %v1902_v54 }
 0x144   : > { %769 = vmatmul.bf16.gmra.mxu3 %v543_v14  ;;  %v480_v13 = vsel %vm472_vm4, %v463_v12, %v464_v11  ;;  %v481_v14 = vsel %vm472_vm4, %v462_v0, %v463_v12  ;;  %v1910_v0 = vld [vmem:[#allocation7 + $0xa0] sm:$0xff]  ;;  %v1908_v12 = vld [vmem:[#allocation7 + $0x90] sm:$0xff] }
 0x145   : > { %v783_v16 = vpack.c.bf16 %v480_v13, %v481_v14  ;;  %1369 = vmatpush.bf16.msrb.mxu1 %v1910_v0  ;;  %v1907_v14 = vld [vmem:[#allocation7 + $0x88] sm:$0xff] }
 0x146   : > { %v2404_v15 = vpop.trf.xlu0  ;;  %1151 = vmatpush.bf16.msrb.mxu3 %v1901_v57 }
 0x147   : > { %v389_v17 = vrot.slane %v2404_v15, 7  ;;  %v470_v39 = vrot.slane %v2404_v15, 1 }
 0x149   : > { %v393_v29 = vsel %vm391_vm0, %v388_v10, %v389_v17  ;;  %v540_v10 = vpack.c.bf16 %v400_v6, %v401_v8  ;;  %v474_v45 = vsel %vm472_vm4, %v469_v41, %v470_v39  ;;  %v1909_v8 = vld [vmem:[#allocation7 + $0x98] sm:$0xff] }
 0x14a   : > { %1370 = vmatpush.bf16.msrb.mxu1 %v1909_v8 }
 0x14e   : > { %v2408_v18 = vpop.trf.xlu0  ;;  %1371 = vmatpush.bf16.msrb.mxu1 %v1908_v12 }
 0x14f   : > { %v390_v20 = vrot.slane %v2408_v18, 7  ;;  %v568_v21 = vpack.c.bf16 %v2408_v18, %v2404_v15  ;;  %v471_v61 = vrot.slane %v2408_v18, 1 }
 0x151   : > { %677 = vmatmul.bf16.gmra.mxu2 %v568_v21  ;;  %v407_v23 = vsel %vm391_vm0, %v390_v20, %v375_v19  ;;  %v392_v27 = vsel %vm391_vm0, %v389_v17, %v390_v20  ;;  %v465_v17 = vrot.slane %v2367_v52, 1  ;;  %v473_v2 = vsel %vm472_vm4, %v470_v39, %v471_v61 }
 0x152   : > { %v1718_v30 = vpack.c.bf16 %v406_v22, %v407_v23  ;;  %v544_v32 = vpack.c.bf16 %v392_v27, %v393_v29  ;;  %v468_v23 = vrot.slane %v2392_v7, 1  ;;  %v467_v27 = vrot.slane %v2383_v63, 1  ;;  %1372 = vmatpush.bf16.msrb.mxu1 %v1907_v14 }
 0x153   : > { %v478_v19 = vsel %vm472_vm4, %v465_v17, %v466_v53  ;;  %v479_v20 = vsel %vm472_vm4, %v464_v11, %v465_v17  ;;  %v488_v3 = vsel %vm472_vm4, %v471_v61, %v456_v37 }
 0x154   : > { %1719 = vmatmul.msk.bf16.vlgmr.msra.gmra.mxu1 %vm2420_vm3, %v1718_v30  ;;  %774 = vmatmul.bf16.gmra.mxu3 %v544_v32  ;;  %v784_v21 = vpack.c.bf16 %v478_v19, %v479_v20  ;;  %v476_v30 = vsel %vm472_vm4, %v467_v27, %v468_v23  ;;  %v477_v32 = vsel %vm472_vm4, %v466_v53, %v467_v27 }
 0x155   : > { %v785_v33 = vpack.c.bf16 %v476_v30, %v477_v32  ;;  %v1754_v6 = vpack.c.bf16 %v488_v3, %v473_v2  ;;  %v2529_v30 = vld [vmem:[%s2771_s2] ss:$0 sm:$0xff] }
 0x15e   : > { %v643_v13 = vpop.f32.mrf.mxu0 }
 0x161   : > { %861 = vmatmul.bf16.vlgmr.msrb.gmra.mxu2 %v780_v43 }
 0x164   : > { %744 = vmatmul.bf16.gmra.mxu1 %v538_v48  ;;  %v475_v48 = vsel %vm472_vm4, %v468_v23, %v469_v41 }
 0x165   : > { %v786_v49 = vpack.c.bf16 %v474_v45, %v475_v48 }
 0x166   : > { %v645_v19 = vpop.f32.mrf.mxu0 }
 0x16e   : > { %v648_v32 = vpop.f32.mrf.mxu0 }
 0x171   : > { %866 = vmatmul.bf16.gmra.mxu2 %v781_v58  ;;  %v342_v58 = vadd.s32 120, %v2364_v50 }
 0x173   : > { %vm1916_vm5 = vcmp.ne.s32.totalorder %v342_v58, 127 }
 0x174   : > { %749 = vmatmul.bf16.gmra.mxu1 %v539_v62  ;;  %v1900_v62 = vld [vmem:[#allocation7 + $0x50] sm:$0xff]  ;;  %vm2516_vm6 = vmpackc.low %vm1916_vm5, %vm2177_vm2 }
 0x175   : > { %1152 = vmatpush.bf16.msrb.mxu3 %v1900_v62 }
 0x179   : > { %1153 = vmatpush.bf16.msrb.mxu3 %v1899_v4 }
 0x181   : > { %871 = vmatmul.bf16.gmra.mxu2 %v782_v5 }
 0x184   : > { %754 = vmatmul.bf16.gmra.mxu1 %v540_v10  ;;  %v1898_v10 = vld [vmem:[#allocation7 + $0x40] sm:$0xff] }
 0x185   : > { %1154 = vmatpush.bf16.msrb.mxu3 %v1898_v10 }
 0x191   : > { %876 = vmatmul.bf16.gmra.mxu2 %v783_v16  ;;  %v1906_v16 = vld [vmem:[#allocation7 + $0x80] sm:$0xff] }
 0x192   : > { %1373 = vmatpush.bf16.msrb.mxu1 %v1906_v16 }
 0x1a1   : > { %881 = vmatmul.bf16.gmra.mxu2 %v784_v21 }
 0x1a4   : > { %v2483_v22 = vpop.f32.mrf.mxu2 }
 0x1ac   : > { %v2487_v29 = vpop.f32.mrf.mxu2 }
 0x1b1   : > { %886 = vmatmul.bf16.gmra.mxu2 %v785_v33 }
 0x1b4   : > { %v2493_v34 = vpop.f32.mrf.mxu2 }
 0x1bc   : > { %v2497_v43 = vpop.f32.mrf.mxu2 }
 0x1c1   : > { %891 = vmatmul.bf16.gmra.mxu2 %v786_v49  ;;  %v650_v49 = vpop.f32.mrf.mxu0 }
 0x1c4   : > { %v2503_v56 = vpop.f32.mrf.mxu2 }
 0x1cc   : > { %v2507_v1 = vpop.f32.mrf.mxu2 }
 0x1d1   : > { %1755 = vmatmul.msk.bf16.gmra.mxu2 %vm2516_vm6, %v1754_v6  ;;  %v740_v11 = vpop.f32.mrf.mxu1 }
 0x1d2   : > { %v741_v21 = vadd.f32 %v740_v11, %v643_v13  ;;  %v653_v11 = vpop.f32.mrf.mxu0 }
 0x1d4   : > { %v2522_v37 = vpop.f32.mrf.mxu2 }
 0x1d9   : > { %v742_v53 = vpop.f32.mrf.mxu1 }
 0x1da   : > { %v743_v33 = vadd.f32 %v742_v53, %v645_v19 }
 0x1dc   : > { %v2524_v17 = vpop.f32.mrf.mxu2 }
 0x1e1   : > { %v745_v23 = vpop.f32.mrf.mxu1 }
 0x1e2   : > { %v746_v51 = vadd.f32 %v745_v23, %v648_v32 }
 0x1e4   : > { %v862_v20 = vpop.f32.mrf.mxu2 }
 0x1e5   : > { %v902_v27 = vadd.f32 %v862_v20, %v741_v21 }
 0x1e7   : > { %v922_v36 = vadd.f32 %v2529_v30, %v902_v27 }
 0x1e9   : > { %v2532_v41 = vmax.f32 %v922_v36, 0.0  ;;  %v747_v46 = vpop.f32.mrf.mxu1 }
 0x1ea   : > { %v748_v6 = vadd.f32 %v747_v46, %v650_v49 }
 0x1eb   : > { %v954_v54 = vrot.slane %v2532_v41, 7  ;;  %v1002_v4 = vrot.slane %v2532_v41, 1 }
 0x1ec   : > { %v864_v39 = vpop.f32.mrf.mxu2 }
 0x1ed   : > { %v903_v40 = vadd.f32 %v864_v39, %v743_v33 }
 0x1ef   : > { %v923_v45 = vadd.f32 %v2529_v30, %v903_v40 }
 0x1f1   : > { %v939_v48 = vmax.f32 %v923_v45, 0.0  ;;  %v750_v3 = vpop.f32.mrf.mxu1  ;;  %v655_v45 = vpop.f32.mrf.mxu0 }
 0x1f2   : > { %v751_v23 = vadd.f32 %v750_v3, %v653_v11 }
 0x1f3   : > { %v955_v55 = vrot.slane %v939_v48, 7  ;;  %v1074_v57 = vpack.c.bf16 %v939_v48, %v2532_v41  ;;  %v1003_v0 = vrot.slane %v939_v48, 1 }
 0x1f4   : > { %v867_v58 = vpop.f32.mrf.mxu2 }
 0x1f5   : > { %v904_v59 = vadd.f32 %v867_v58, %v746_v51  ;;  %1155 = vmatmul.bf16.vlgmr.msrb.gmra.mxu3 %v1074_v57  ;;  %v2541_v61 = vsel %vm391_vm0, %v954_v54, %v955_v55  ;;  %v1032_v16 = vsel %vm472_vm4, %v1002_v4, %v1003_v0 }
 0x1f7   : > { %v924_v62 = vadd.f32 %v2529_v30, %v904_v59 }
 0x1f9   : > { %v940_v2 = vmax.f32 %v924_v62, 0.0  ;;  %v752_v33 = vpop.f32.mrf.mxu1 }
 0x1fa   : > { %v753_v57 = vadd.f32 %v752_v33, %v655_v45 }
 0x1fb   : > { %v1004_v8 = vrot.slane %v940_v2, 1  ;;  %v956_v10 = vrot.slane %v940_v2, 7 }
 0x1fc   : > { %v869_v12 = vpop.f32.mrf.mxu2 }
 0x1fd   : > { %v905_v13 = vadd.f32 %v869_v12, %v748_v6  ;;  %v1031_v14 = vsel %vm472_vm4, %v1003_v0, %v1004_v8  ;;  %v2553_v53 = vsel %vm391_vm0, %v955_v55, %v956_v10  ;;  %v1897_v55 = vld [vmem:[#allocation7 + $0x38] sm:$0xff] }
 0x1fe   : > { %v1293_v19 = vpack.c.bf16 %v1031_v14, %v1032_v16  ;;  %1244 = vmatpush.bf16.msrb.mxu0 %v1897_v55  ;;  %v1896_v16 = vld [vmem:[#allocation7 + $0x30] sm:$0xff] }
 0x1ff   : > { %v925_v20 = vadd.f32 %v2529_v30, %v905_v13  ;;  %v658_v13 = vpop.f32.mrf.mxu0 }
 0x200   : > { %1374 = vmatmul.bf16.vlgmr.msrb.gmra.mxu1 %v1293_v19  ;;  %v760_v19 = vpop.f32.mrf.mxu3 }
 0x201   : > { %v941_v21 = vmax.f32 %v925_v20, 0.0 }
 0x202   : > { %1245 = vmatpush.bf16.msrb.mxu0 %v1896_v16  ;;  %v1894_v16 = vld [vmem:[#allocation7 + $0x20] sm:$0xff] }
 0x203   : > { %v1075_v27 = vpack.c.bf16 %v941_v21, %v940_v2  ;;  %v957_v32 = vrot.slane %v941_v21, 7  ;;  %v1005_v51 = vrot.slane %v941_v21, 1 }
 0x204   : > { %v872_v36 = vpop.f32.mrf.mxu2 }
 0x205   : > { %v906_v39 = vadd.f32 %v872_v36, %v751_v23  ;;  %1160 = vmatmul.bf16.gmra.mxu3 %v1075_v27  ;;  %v2558_v40 = vsel %vm391_vm0, %v956_v10, %v957_v32  ;;  %v1030_v3 = vsel %vm472_vm4, %v1004_v8, %v1005_v51  ;;  %v755_v10 = vpop.f32.mrf.mxu1 }
 0x206   : > { %v1051_v46 = vpack.c.bf16 %v2558_v40, %v2553_v53  ;;  %v756_v20 = vadd.f32 %v755_v10, %v658_v13 }
 0x207   : > { %v926_v48 = vadd.f32 %v2529_v30, %v906_v39  ;;  %v660_v55 = vpop.f32.mrf.mxu0 }
 0x209   : > { %v942_v49 = vmax.f32 %v926_v48, 0.0 }
 0x20b   : > { %v1006_v58 = vrot.slane %v942_v49, 1  ;;  %v958_v59 = vrot.slane %v942_v49, 7 }
 0x20c   : > { %v874_v62 = vpop.f32.mrf.mxu2 }
 0x20d   : > { %v907_v0 = vadd.f32 %v874_v62, %v753_v57  ;;  %v1029_v2 = vsel %vm472_vm4, %v1005_v51, %v1006_v58  ;;  %v2569_v6 = vsel %vm391_vm0, %v957_v32, %v958_v59  ;;  %v757_v39 = vpop.f32.mrf.mxu1  ;;  %v1895_v51 = vld [vmem:[#allocation7 + $0x28] sm:$0xff] }
 0x20e   : > { %v1294_v11 = vpack.c.bf16 %v1029_v2, %v1030_v3  ;;  %1246 = vmatpush.bf16.msrb.mxu0 %v1895_v51 }
 0x20f   : > { %v927_v12 = vadd.f32 %v2529_v30, %v907_v0  ;;  %v762_v0 = vpop.f32.mrf.mxu3 }
 0x210   : > { %1379 = vmatmul.bf16.gmra.mxu1 %v1294_v11 }
 0x211   : > { %v943_v14 = vmax.f32 %v927_v12, 0.0 }
 0x212   : > { %1247 = vmatpush.bf16.msrb.mxu0 %v1894_v16 }
 0x213   : > { %v1076_v21 = vpack.c.bf16 %v943_v14, %v942_v49  ;;  %v959_v23 = vrot.slane %v943_v14, 7  ;;  %v1007_v48 = vrot.slane %v943_v14, 1  ;;  %v758_v49 = vadd.f32 %v757_v39, %v660_v55 }
 0x214   : > { %v877_v27 = vpop.f32.mrf.mxu2 }
 0x215   : > { %v908_v33 = vadd.f32 %v877_v27, %v756_v20  ;;  %1165 = vmatmul.bf16.gmra.mxu3 %v1076_v21  ;;  %v2574_v8 = vsel %vm391_vm0, %v958_v59, %v959_v23  ;;  %v1028_v10 = vsel %vm472_vm4, %v1006_v58, %v1007_v48  ;;  %v761_v20 = vadd.f32 %v760_v19, %v2483_v22 }
 0x216   : > { %v1052_v32 = vpack.c.bf16 %v2574_v8, %v2569_v6  ;;  %v763_v22 = vadd.f32 %v762_v0, %v2487_v29  ;;  %v1892_v0 = vld [vmem:[#allocation7 + $0x10] sm:$0xff] }
 0x217   : > { %v928_v36 = vadd.f32 %v2529_v30, %v908_v33 }
 0x219   : > { %v944_v45 = vmax.f32 %v928_v36, 0.0 }
 0x21b   : > { %v1008_v57 = vrot.slane %v944_v45, 1  ;;  %v960_v62 = vrot.slane %v944_v45, 7 }
 0x21c   : > { %v879_v2 = vpop.f32.mrf.mxu2 }
 0x21d   : > { %v909_v3 = vadd.f32 %v879_v2, %v758_v49  ;;  %v1027_v59 = vsel %vm472_vm4, %v1007_v48, %v1008_v57  ;;  %v2585_v11 = vsel %vm391_vm0, %v959_v23, %v960_v62  ;;  %v765_v23 = vpop.f32.mrf.mxu3  ;;  %v1893_v49 = vld [vmem:[#allocation7 + $0x18] sm:$0xff] }
 0x21e   : > { %v1295_v12 = vpack.c.bf16 %v1027_v59, %v1028_v10  ;;  %1248 = vmatpush.bf16.msrb.mxu0 %v1893_v49  ;;  %v766_v16 = vadd.f32 %v765_v23, %v2493_v34  ;;  %v1891_v23 = vld [vmem:[#allocation7 + $0x8] sm:$0xff] }
 0x21f   : > { %v929_v13 = vadd.f32 %v2529_v30, %v909_v3 }
 0x220   : > { %1384 = vmatmul.bf16.gmra.mxu1 %v1295_v12 }
 0x221   : > { %v945_v14 = vmax.f32 %v929_v13, 0.0 }
 0x222   : > { %1249 = vmatpush.bf16.msrb.mxu0 %v1892_v0 }
 0x223   : > { %v1077_v21 = vpack.c.bf16 %v945_v14, %v944_v45  ;;  %v961_v27 = vrot.slane %v945_v14, 7  ;;  %v1009_v55 = vrot.slane %v945_v14, 1 }
 0x224   : > { %v882_v33 = vpop.f32.mrf.mxu2 }
 0x225   : > { %v910_v36 = vadd.f32 %v882_v33, %v761_v20  ;;  %1170 = vmatmul.bf16.gmra.mxu3 %v1077_v21  ;;  %v2591_v58 = vsel %vm391_vm0, %v960_v62, %v961_v27  ;;  %v1026_v59 = vsel %vm472_vm4, %v1008_v57, %v1009_v55  ;;  %v767_v14 = vpop.f32.mrf.mxu3 }
 0x226   : > { %v1053_v39 = vpack.c.bf16 %v2591_v58, %v2585_v11  ;;  %1250 = vmatpush.bf16.msrb.mxu0 %v1891_v23 }
 0x227   : > { %v930_v48 = vadd.f32 %v2529_v30, %v910_v36 }
 0x229   : > { %v946_v51 = vmax.f32 %v930_v48, 0.0 }
 0x22b   : > { %v1010_v19 = vrot.slane %v946_v51, 1  ;;  %v962_v45 = vrot.slane %v946_v51, 7 }
 0x22c   : > { %v884_v2 = vpop.f32.mrf.mxu2 }
 0x22d   : > { %v911_v3 = vadd.f32 %v884_v2, %v763_v22  ;;  %v1025_v62 = vsel %vm472_vm4, %v1009_v55, %v1010_v19  ;;  %v2603_v10 = vsel %vm391_vm0, %v961_v27, %v962_v45  ;;  %v768_v22 = vadd.f32 %v767_v14, %v2497_v43 }
 0x22e   : > { %v1296_v12 = vpack.c.bf16 %v1025_v62, %v1026_v59 }
 0x22f   : > { %v931_v13 = vadd.f32 %v2529_v30, %v911_v3 }
 0x230   : > { %1389 = vmatmul.bf16.gmra.mxu1 %v1296_v12 }
 0x231   : > { %v947_v29 = vmax.f32 %v931_v13, 0.0 }
 0x233   : > { %v1078_v20 = vpack.c.bf16 %v947_v29, %v946_v51  ;;  %v1011_v21 = vrot.slane %v947_v29, 1  ;;  %v963_v33 = vrot.slane %v947_v29, 7  ;;  %v770_v51 = vpop.f32.mrf.mxu3 }
 0x234   : > { %v887_v36 = vpop.f32.mrf.mxu2  ;;  %v771_v0 = vadd.f32 %v770_v51, %v2503_v56 }
 0x235   : > { %v912_v48 = vadd.f32 %v887_v36, %v766_v16  ;;  %1175 = vmatmul.bf16.gmra.mxu3 %v1078_v20  ;;  %v1024_v57 = vsel %vm472_vm4, %v1010_v19, %v1011_v21  ;;  %v2611_v27 = vsel %vm391_vm0, %v962_v45, %v963_v33  ;;  %v1890_v16 = vld [vmem:[#allocation7] sm:$0xff] }
 0x236   : > { %v1054_v55 = vpack.c.bf16 %v2611_v27, %v2603_v10  ;;  %1251 = vmatpush.bf16.msrb.mxu0 %v1890_v16 }
 0x237   : > { %v932_v49 = vadd.f32 %v2529_v30, %v912_v48 }
 0x239   : > { %v948_v34 = vmax.f32 %v932_v49, 0.0 }
 0x23b   : > { %v1012_v2 = vrot.slane %v948_v34, 1  ;;  %v964_v3 = vrot.slane %v948_v34, 7  ;;  %v772_v36 = vpop.f32.mrf.mxu3 }
 0x23c   : > { %v889_v62 = vpop.f32.mrf.mxu2 }
 0x23d   : > { %v913_v59 = vadd.f32 %v889_v62, %v768_v22  ;;  %v1023_v19 = vsel %vm472_vm4, %v1011_v21, %v1012_v2  ;;  %v2621_v45 = vsel %vm391_vm0, %v963_v33, %v964_v3 }
 0x23e   : > { %v1297_v12 = vpack.c.bf16 %v1023_v19, %v1024_v57 }
 0x23f   : > { %v933_v13 = vadd.f32 %v2529_v30, %v913_v59 }
 0x240   : > { %1394 = vmatmul.bf16.gmra.mxu1 %v1297_v12 }
 0x241   : > { %v949_v29 = vmax.f32 %v933_v13, 0.0 }
 0x243   : > { %v1079_v43 = vpack.c.bf16 %v949_v29, %v948_v34  ;;  %v1013_v14 = vrot.slane %v949_v29, 1  ;;  %v965_v20 = vrot.slane %v949_v29, 7  ;;  %v773_v34 = vadd.f32 %v772_v36, %v2507_v1  ;;  %v775_v12 = vpop.f32.mrf.mxu3 }
 0x244   : > { %v892_v48 = vpop.f32.mrf.mxu2  ;;  %v776_v29 = vadd.f32 %v775_v12, %v2522_v37 }
 0x245   : > { %v914_v49 = vadd.f32 %v892_v48, %v771_v0  ;;  %1180 = vmatmul.bf16.gmra.mxu3 %v1079_v43  ;;  %v1022_v21 = vsel %vm472_vm4, %v1012_v2, %v1013_v14  ;;  %v974_v33 = vsel %vm391_vm0, %v964_v3, %v965_v20 }
 0x246   : > { %v1055_v57 = vpack.c.bf16 %v974_v33, %v2621_v45 }
 0x247   : > { %v934_v23 = vadd.f32 %v2529_v30, %v914_v49 }
 0x249   : > { %v950_v56 = vmax.f32 %v934_v23, 0.0 }
 0x24b   : > { %v1014_v51 = vrot.slane %v950_v56, 1  ;;  %v966_v22 = vrot.slane %v950_v56, 7 }
 0x24c   : > { %v894_v62 = vpop.f32.mrf.mxu2 }
 0x24d   : > { %v915_v59 = vadd.f32 %v894_v62, %v773_v34  ;;  %v1021_v19 = vsel %vm472_vm4, %v1013_v14, %v1014_v51  ;;  %v973_v2 = vsel %vm391_vm0, %v965_v20, %v966_v22 }
 0x24e   : > { %v1298_v13 = vpack.c.bf16 %v1021_v19, %v1022_v21  ;;  %v777_v21 = vpop.f32.mrf.mxu3 }
 0x24f   : > { %v935_v3 = vadd.f32 %v2529_v30, %v915_v59  ;;  %v778_v23 = vadd.f32 %v777_v21, %v2524_v17 }
 0x250   : > { %1399 = vmatmul.bf16.gmra.mxu1 %v1298_v13 }
 0x251   : > { %v951_v45 = vmax.f32 %v935_v3, 0.0 }
 0x253   : > { %v1080_v0 = vpack.c.bf16 %v951_v45, %v950_v56  ;;  %v1015_v1 = vrot.slane %v951_v45, 1  ;;  %v967_v43 = vrot.slane %v951_v45, 7 }
 0x254   : > { %v897_v16 = vpop.f32.mrf.mxu2 }
 0x255   : > { %v916_v36 = vadd.f32 %v897_v16, %v776_v29  ;;  %1185 = vmatmul.bf16.gmra.mxu3 %v1080_v0  ;;  %v1020_v14 = vsel %vm472_vm4, %v1014_v51, %v1015_v1  ;;  %v972_v20 = vsel %vm391_vm0, %v966_v22, %v967_v43 }
 0x256   : > { %v1056_v48 = vpack.c.bf16 %v972_v20, %v973_v2 }
 0x257   : > { %v936_v49 = vadd.f32 %v2529_v30, %v916_v36 }
 0x259   : > { %v952_v33 = vmax.f32 %v936_v49, 0.0 }
 0x25b   : > { %v1016_v37 = vrot.slane %v952_v33, 1  ;;  %v968_v56 = vrot.slane %v952_v33, 7 }
 0x25c   : > { %v899_v34 = vpop.f32.mrf.mxu2 }
 0x25d   : > { %v917_v62 = vadd.f32 %v899_v34, %v778_v23  ;;  %v1019_v59 = vsel %vm472_vm4, %v1015_v1, %v1016_v37  ;;  %v971_v51 = vsel %vm391_vm0, %v967_v43, %v968_v56 }
 0x25e   : > { %v1299_v19 = vpack.c.bf16 %v1019_v59, %v1020_v14 }
 0x25f   : > { %v937_v22 = vadd.f32 %v2529_v30, %v917_v62 }
 0x260   : > { %1404 = vmatmul.bf16.gmra.mxu1 %v1299_v19 }
 0x261   : > { %v953_v2 = vmax.f32 %v937_v22, 0.0 }
 0x263   : > { %v969_v12 = vrot.slane %v953_v2, 7  ;;  %v1017_v13 = vrot.slane %v953_v2, 1  ;;  %v1081_v3 = vpack.c.bf16 %v953_v2, %v952_v33 }
 0x265   : > { %1190 = vmatmul.bf16.gmra.mxu3 %v1081_v3  ;;  %v985_v17 = vsel %vm391_vm0, %v969_v12, %v954_v54  ;;  %v1018_v45 = vsel %vm472_vm4, %v1016_v37, %v1017_v13  ;;  %v1033_v29 = vsel %vm472_vm4, %v1017_v13, %v1002_v4  ;;  %v970_v30 = vsel %vm391_vm0, %v968_v56, %v969_v12 }
 0x266   : > { %v1822_v0 = vpack.c.bf16 %v2541_v61, %v985_v17  ;;  %v1858_v1 = vpack.c.bf16 %v1033_v29, %v1018_v45  ;;  %v1057_v43 = vpack.c.bf16 %v970_v30, %v971_v51 }
 0x268   : > { %1823 = vmatmul.msk.bf16.vlgmr.msrb.gmra.mxu0 %vm2420_vm3, %v1822_v0 }
 0x270   : > { %1859 = vmatmul.msk.bf16.gmra.mxu1 %vm2516_vm6, %v1858_v1 }
 0x278   : > { %1257 = vmatmul.bf16.gmra.mxu0 %v1051_v46  ;;  %v1156_v50 = vpop.f32.mrf.mxu3  ;;  %v2681_v46 = vld [vmem:[%s2773_s4] ss:$0 sm:$0xff] }
 0x27d   : > { %v1375_v26 = vpop.f32.mrf.mxu1 }
 0x280   : > { %v1158_v5 = vpop.f32.mrf.mxu3 }
 0x285   : > { %v1377_v41 = vpop.f32.mrf.mxu1 }
 0x288   : > { %1262 = vmatmul.bf16.gmra.mxu0 %v1052_v32  ;;  %v1161_v54 = vpop.f32.mrf.mxu3 }
 0x28d   : > { %v1380_v61 = vpop.f32.mrf.mxu1 }
 0x290   : > { %v1163_v4 = vpop.f32.mrf.mxu3 }
 0x295   : > { %v1382_v6 = vpop.f32.mrf.mxu1 }
 0x298   : > { %1267 = vmatmul.bf16.gmra.mxu0 %v1053_v39  ;;  %v1166_v27 = vpop.f32.mrf.mxu3 }
 0x2a0   : > { %v1168_v21 = vpop.f32.mrf.mxu3 }
 0x2a8   : > { %1272 = vmatmul.bf16.gmra.mxu0 %v1054_v55  ;;  %v1171_v51 = vpop.f32.mrf.mxu3 }
 0x2b0   : > { %v1173_v17 = vpop.f32.mrf.mxu3 }
 0x2b8   : > { %1277 = vmatmul.bf16.gmra.mxu0 %v1055_v57  ;;  %v1385_v57 = vpop.f32.mrf.mxu1 }
 0x2c8   : > { %1282 = vmatmul.bf16.gmra.mxu0 %v1056_v48 }
 0x2d8   : > { %1287 = vmatmul.bf16.gmra.mxu0 %v1057_v43 }
 0x2e5   : > { %v1253_v53 = vpop.f32.mrf.mxu0 }
 0x2e6   : > { %v1254_v40 = vadd.f32 %v1253_v53, %v1156_v50 }
 0x2e8   : > { %v1415_v8 = vadd.f32 %v1375_v26, %v1254_v40 }
 0x2ea   : > { %v1435_v32 = vadd.f32 %v2681_v46, %v1415_v8 }
 0x2ec   : > { %v1451_v11 = vadd.f32 %v1435_v32, %v2338_v24  ;;  %v1387_v24 = vpop.f32.mrf.mxu1 }
 0x2ed   : > { %v1255_v58 = vpop.f32.mrf.mxu0 }
 0x2ee   : > { %v1256_v39 = vadd.f32 %v1255_v58, %v1158_v5  ;;  %v1467_v10 = vmax.f32 %v1451_v11, 0.0 }
 0x2f0   : > { %v1416_v55 = vadd.f32 %v1377_v41, %v1256_v39  ;;  %1483 = vxpose.xlu1.b32.start [1/16] %v1467_v10, 128  ;;  %v1176_v41 = vpop.f32.mrf.mxu3 }
 0x2f2   : > { %v1436_v16 = vadd.f32 %v2681_v46, %v1416_v55 }
 0x2f4   : > { %v1452_v36 = vadd.f32 %v1436_v16, %v2340_v25  ;;  %v1390_v19 = vpop.f32.mrf.mxu1 }
 0x2f5   : > { %v1258_v14 = vpop.f32.mrf.mxu0 }
 0x2f6   : > { %v1259_v20 = vadd.f32 %v1258_v14, %v1161_v54  ;;  %v1468_v48 = vmax.f32 %v1452_v36, 0.0 }
 0x2f8   : > { %v1417_v49 = vadd.f32 %v1380_v61, %v1259_v20  ;;  %1484 = vxpose.xlu1.b32.cont [2/16] %v1468_v48, 128  ;;  %v1178_v32 = vpop.f32.mrf.mxu3 }
 0x2fa   : > { %v1437_v33 = vadd.f32 %v2681_v46, %v1417_v49 }
 0x2fc   : > { %v1453_v23 = vadd.f32 %v1437_v33, %v2344_v28  ;;  %v1392_v0 = vpop.f32.mrf.mxu1 }
 0x2fd   : > { %v1260_v37 = vpop.f32.mrf.mxu0 }
 0x2fe   : > { %v1261_v56 = vadd.f32 %v1260_v37, %v1163_v4  ;;  %v1469_v34 = vmax.f32 %v1453_v23, 0.0 }
 0x300   : > { %v1418_v62 = vadd.f32 %v1382_v6, %v1261_v56  ;;  %1485 = vxpose.xlu1.b32.cont [3/16] %v1469_v34, 128  ;;  %v1181_v16 = vpop.f32.mrf.mxu3 }
 0x302   : > { %v1438_v59 = vadd.f32 %v2681_v46, %v1418_v62 }
 0x304   : > { %v1454_v25 = vadd.f32 %v1438_v59, %v2346_v31  ;;  %v1395_v61 = vpop.f32.mrf.mxu1 }
 0x305   : > { %v1263_v22 = vpop.f32.mrf.mxu0 }
 0x306   : > { %v1264_v2 = vadd.f32 %v1263_v22, %v1166_v27  ;;  %v1470_v12 = vmax.f32 %v1454_v25, 0.0 }
 0x308   : > { %v1419_v13 = vadd.f32 %v1385_v57, %v1264_v2  ;;  %1486 = vxpose.xlu1.b32.cont [4/16] %v1470_v12, 128  ;;  %v1183_v33 = vpop.f32.mrf.mxu3 }
 0x30a   : > { %v1439_v3 = vadd.f32 %v2681_v46, %v1419_v13 }
 0x30c   : > { %v1455_v28 = vadd.f32 %v1439_v3, %v2350_v35 }
 0x30d   : > { %v1265_v45 = vpop.f32.mrf.mxu0 }
 0x30e   : > { %v1266_v29 = vadd.f32 %v1265_v45, %v1168_v21  ;;  %v1471_v30 = vmax.f32 %v1455_v28, 0.0 }
 0x310   : > { %v1420_v1 = vadd.f32 %v1387_v24, %v1266_v29  ;;  %1487 = vxpose.xlu1.b32.cont [5/16] %v1471_v30, 128 }
 0x312   : > { %v1440_v43 = vadd.f32 %v2681_v46, %v1420_v1 }
 0x314   : > { %v1456_v31 = vadd.f32 %v1440_v43, %v2352_v38  ;;  %v1397_v38 = vpop.f32.mrf.mxu1 }
 0x315   : > { %v1268_v50 = vpop.f32.mrf.mxu0 }
 0x316   : > { %v1269_v26 = vadd.f32 %v1268_v50, %v1171_v51  ;;  %v1472_v5 = vmax.f32 %v1456_v31, 0.0 }
 0x318   : > { %v1421_v54 = vadd.f32 %v1390_v19, %v1269_v26  ;;  %1488 = vxpose.xlu1.b32.cont [6/16] %v1472_v5, 128  ;;  %v1186_v19 = vpop.f32.mrf.mxu3 }
 0x31a   : > { %v1441_v35 = vadd.f32 %v2681_v46, %v1421_v54 }
 0x31c   : > { %v1457_v4 = vadd.f32 %v1441_v35, %v2356_v42  ;;  %v1400_v36 = vpop.f32.mrf.mxu1 }
 0x31d   : > { %v1270_v53 = vpop.f32.mrf.mxu0 }
 0x31e   : > { %v1271_v40 = vadd.f32 %v1270_v53, %v1173_v17  ;;  %v1473_v6 = vmax.f32 %v1457_v4, 0.0 }
 0x320   : > { %v1422_v8 = vadd.f32 %v1392_v0, %v1271_v40  ;;  %1489 = vxpose.xlu1.b32.cont [7/16] %v1473_v6, 128  ;;  %v1188_v45 = vpop.f32.mrf.mxu3 }
 0x322   : > { %v1442_v11 = vadd.f32 %v2681_v46, %v1422_v8 }
 0x324   : > { %v1458_v58 = vadd.f32 %v1442_v11, %v2358_v44  ;;  %v1402_v56 = vpop.f32.mrf.mxu1 }
 0x325   : > { %v1273_v39 = vpop.f32.mrf.mxu0 }
 0x326   : > { %v1274_v10 = vadd.f32 %v1273_v39, %v1176_v41  ;;  %v1474_v27 = vmax.f32 %v1458_v58, 0.0 }
 0x328   : > { %v1423_v55 = vadd.f32 %v1395_v61, %v1274_v10  ;;  %1490 = vxpose.xlu1.b32.cont [8/16] %v1474_v27, 128  ;;  %v1191_v26 = vpop.f32.mrf.mxu3 }
 0x32a   : > { %v1443_v57 = vadd.f32 %v2681_v46, %v1423_v55 }
 0x32c   : > { %v1459_v42 = vadd.f32 %v1443_v57, %v2362_v47  ;;  %v1405_v2 = vpop.f32.mrf.mxu1 }
 0x32d   : > { %v1275_v14 = vpop.f32.mrf.mxu0 }
 0x32e   : > { %v1276_v20 = vadd.f32 %v1275_v14, %v1178_v32  ;;  %v1475_v48 = vmax.f32 %v1459_v42, 0.0 }
 0x330   : > { %v1424_v49 = vadd.f32 %v1397_v38, %v1276_v20  ;;  %1491 = vxpose.xlu1.b32.cont [9/16] %v1475_v48, 128  ;;  %v1193_v53 = vpop.f32.mrf.mxu3 }
 0x332   : > { %v1444_v21 = vadd.f32 %v2681_v46, %v1424_v49 }
 0x334   : > { %v1460_v44 = vadd.f32 %v1444_v21, %v2367_v52 }
 0x335   : > { %v1278_v24 = vpop.f32.mrf.mxu0 }
 0x336   : > { %v1279_v23 = vadd.f32 %v1278_v24, %v1181_v16  ;;  %v1476_v37 = vmax.f32 %v1460_v44, 0.0 }
 0x338   : > { %v1425_v34 = vadd.f32 %v1400_v36, %v1279_v23  ;;  %1492 = vxpose.xlu1.b32.cont [10/16] %v1476_v37, 128 }
 0x33a   : > { %v1445_v62 = vadd.f32 %v2681_v46, %v1425_v34 }
 0x33c   : > { %v1461_v47 = vadd.f32 %v1445_v62, %v2380_v60  ;;  %v1407_v60 = vpop.f32.mrf.mxu1 }
 0x33d   : > { %v1280_v59 = vpop.f32.mrf.mxu0 }
 0x33e   : > { %v1281_v51 = vadd.f32 %v1280_v59, %v1183_v33  ;;  %v1477_v25 = vmax.f32 %v1461_v47, 0.0 }
 0x340   : > { %v1426_v22 = vadd.f32 %v1402_v56, %v1281_v51  ;;  %1493 = vxpose.xlu1.b32.cont [11/16] %v1477_v25, 128 }
 0x342   : > { %v1446_v52 = vadd.f32 %v2681_v46, %v1426_v22 }
 0x344   : > { %v1462_v12 = vadd.f32 %v1446_v52, %v2383_v63  ;;  %v1410_v5 = vpop.f32.mrf.mxu1 }
 0x345   : > { %v1283_v13 = vpop.f32.mrf.mxu0 }
 0x346   : > { %v1284_v3 = vadd.f32 %v1283_v13, %v1186_v19  ;;  %v1478_v28 = vmax.f32 %v1462_v12, 0.0 }
 0x348   : > { %v1427_v17 = vadd.f32 %v1405_v2, %v1284_v3  ;;  %1494 = vxpose.xlu1.b32.cont [12/16] %v1478_v28, 128 }
 0x34a   : > { %v1447_v29 = vadd.f32 %v2681_v46, %v1427_v17 }
 0x34c   : > { %v1463_v30 = vadd.f32 %v1447_v29, %v2392_v7  ;;  %v1412_v32 = vpop.f32.mrf.mxu1 }
 0x34d   : > { %v1285_v0 = vpop.f32.mrf.mxu0 }
 0x34e   : > { %v1286_v1 = vadd.f32 %v1285_v0, %v1188_v45  ;;  %v1479_v43 = vmax.f32 %v1463_v30, 0.0 }
 0x350   : > { %v1428_v31 = vadd.f32 %v1407_v60, %v1286_v1  ;;  %1495 = vxpose.xlu1.b32.cont [13/16] %v1479_v43, 128 }
 0x352   : > { %v1448_v50 = vadd.f32 %v2681_v46, %v1428_v31 }
 0x354   : > { %v1464_v63 = vadd.f32 %v1448_v50, %v2395_v9 }
 0x355   : > { %v1288_v41 = vpop.f32.mrf.mxu0 }
 0x356   : > { %v1289_v54 = vadd.f32 %v1288_v41, %v1191_v26  ;;  %v1480_v61 = vmax.f32 %v1464_v63, 0.0 }
 0x358   : > { %v1429_v35 = vadd.f32 %v1410_v5, %v1289_v54  ;;  %1496 = vxpose.xlu1.b32.cont [14/16] %v1480_v61, 128 }
 0x35a   : > { %v1449_v4 = vadd.f32 %v2681_v46, %v1429_v35 }
 0x35c   : > { %v1465_v7 = vadd.f32 %v1449_v4, %v2404_v15 }
 0x35d   : > { %v1290_v40 = vpop.f32.mrf.mxu0 }
 0x35e   : > { %v1291_v6 = vadd.f32 %v1290_v40, %v1193_v53  ;;  %v1481_v8 = vmax.f32 %v1465_v7, 0.0 }
 0x360   : > { %v1430_v11 = vadd.f32 %v1412_v32, %v1291_v6  ;;  %1497 = vxpose.xlu1.b32.cont [15/16] %v1481_v8, 128 }
 0x362   : > { %v1450_v9 = vadd.f32 %v2681_v46, %v1430_v11 }
 0x364   : > { %v1466_v38 = vadd.f32 %v1450_v9, %v2408_v18 }
 0x366   : > { %v1482_v58 = vmax.f32 %v1466_v38, 0.0 }
 0x368   : > { %1498 = vxpose.xlu1.b32.end [16/16] %v1482_v58, 128 }
 0x394   : > { %v1499_v39 = vpop.trf.xlu1 }
 0x395   : > { %1515 = vst [vmem:[%s2717_s11] sm:$0xff] %v1499_v39 }
 0x39c   : > { %v1500_v15 = vpop.trf.xlu1 }
 0x39d   : > { %1516 = vst [vmem:[%s2717_s11 + $0x8] sm:$0xff] %v1500_v15 }
 0x3a4   : > { %v1501_v18 = vpop.trf.xlu1 }
 0x3a5   : > { %1517 = vst [vmem:[%s2717_s11 + $0x10] sm:$0xff] %v1501_v18 }
 0x3ac   : > { %v1502_v46 = vpop.trf.xlu1 }
 0x3ad   : > { %1518 = vst [vmem:[%s2717_s11 + $0x18] sm:$0xff] %v1502_v46 }
 0x3b4   : > { %v1503_v10 = vpop.trf.xlu1 }
 0x3b5   : > { %1519 = vst [vmem:[%s2717_s11 + $0x20] sm:$0xff] %v1503_v10 }
 0x3bc   : > { %v1504_v27 = vpop.trf.xlu1 }
 0x3bd   : > { %1520 = vst [vmem:[%s2717_s11 + $0x28] sm:$0xff] %v1504_v27 }
 0x3c4   : > { %v1505_v55 = vpop.trf.xlu1 }
 0x3c5   : > { %1521 = vst [vmem:[%s2717_s11 + $0x30] sm:$0xff] %v1505_v55 }
 0x3cc   : > { %v1506_v57 = vpop.trf.xlu1 }
 0x3cd   : > { %1522 = vst [vmem:[%s2717_s11 + $0x38] sm:$0xff] %v1506_v57 }
 0x3d4   : > { %v1507_v16 = vpop.trf.xlu1 }
 0x3d5   : > { %1523 = vst [vmem:[%s2717_s11 + $0x40] sm:$0xff] %v1507_v16 }
 0x3dc   : > { %v1508_v42 = vpop.trf.xlu1 }
 0x3dd   : > { %1524 = vst [vmem:[%s2717_s11 + $0x48] sm:$0xff] %v1508_v42 }
 0x3e4   : > { %v1509_v36 = vpop.trf.xlu1 }
 0x3e5   : > { %1525 = vst [vmem:[%s2717_s11 + $0x50] sm:$0xff] %v1509_v36 }
 0x3ec   : > { %v1510_v14 = vpop.trf.xlu1 }
 0x3ed   : > { %1526 = vst [vmem:[%s2717_s11 + $0x58] sm:$0xff] %v1510_v14 }
 0x3f4   : > { %v1511_v20 = vpop.trf.xlu1 }
 0x3f5   : > { %1527 = vst [vmem:[%s2717_s11 + $0x60] sm:$0xff] %v1511_v20 }
 0x3fc   : > { %v1512_v48 = vpop.trf.xlu1 }
 0x3fd   : > { %1528 = vst [vmem:[%s2717_s11 + $0x68] sm:$0xff] %v1512_v48 }
 0x404   : > { %v1513_v49 = vpop.trf.xlu1 }
 0x405   : > { %1529 = vst [vmem:[%s2717_s11 + $0x70] sm:$0xff] %v1513_v49 }
 0x40c   : > { %v1514_v21 = vpop.trf.xlu1 }
 0x40d   : > { %1530 = vst [vmem:[%s2717_s11 + $0x78] sm:$0xff] %v1514_v21 }
 0x40e   : > { %2126 = shalt.err (!%p2123_p10)
}
 0x40f   : > { %s2178_s8 = smov 128   ;;  %s2179_s10 = smov 8  }
 0x410   : > { %1943 = dma.vmem_to_hbm [thread:$0]  (%p2276_p3), %s1545_s6, 2048, %s1547_s26, %s1532_s7, %s2178_s8, %s2178_s8, %s2179_s10  }
 0x411 PF: > { %s1561_s11 = sand.u32 1, %s2157_s18   ;;  %p2784_p12 = scmp.ge.s32.totalorder %s2169_s21, 2 }
 0x412   : > { %s1562_s12 = scalar_lea.sflag [#allocation4], %s1561_s11 }
 0x413   : > { %p1957_p13 = pnand %p2784_p12, %p2245_p6 }
 0x415   : > { %p1958_p0 = pneg %p1957_p13 }
 0x417   : > { %2152 = dma.done.wait (%p1958_p0), %s1562_s12, 2048  }
 0x418   : > { %2154 = vsyncadd (%p1958_p0), %s1562_s12, 4294965248  ;;  %p19_p5 = scmp.ge.s32.totalorder %s2266_s14, 4   ;;  %s2785_s18 = smov %s2161_s19 }
 0x419   : > { %s2786_s19 = smov %s2165_s20  ;;  %s2787_s20 = smov %s2282_s23 }
 0x41a   : > { %s2788_s21 = smov %s2266_s14  ;;  %21 = sbr.rel (!%p19_p5) target bundleno = 6 (0x6), region = 97 }
 0x41f   :  { %1568 = vsyncpa [#allocation3], 1 }
 0x420   :  { %1570 = vsyncpa [#allocation3 + $0x1], 1 }
 0x421   :  { %1571 = vsyncpa [#allocation6], 1 }
 0x422   :  { %1572 = vsyncpa [#allocation4], 1 }
 0x423   :  { %1574 = vsyncpa [#allocation4 + $0x1], 1 }

</bundles_post_ra>
